<compile_context>
chip_gen: v7x
topology: tpu7x:2x2x1
jax: 0.10.0
libtpu: 0.0.40
codegen_flags: <defaults>
</compile_context>

<pallas_src>
import functools

import jax
import jax.numpy as jnp
from jax import lax
from jax.experimental import pallas as pl
from jax.experimental.pallas import tpu as pltpu


def _focal_loss_kernel(x_ref, xt_ref, a_ref, o_ref, *, gamma, batch_total,
                       tile_rows):
    i = pl.program_id(0)

    x = x_ref[...].astype(jnp.float32)        # (TB, C) logits, upcast in-kernel
    x_t = xt_ref[...]                         # (TB, 1) f32 target-class logit
    alpha_row = a_ref[...]                    # (TB, 1) f32 alpha[target]
    TB = x.shape[0]

    # Validity mask for the (possibly ragged) last tile — defensive only, since
    # padded rows are row-independent and never written back.
    row_ids = lax.broadcasted_iota(jnp.int32, (TB, 1), 0) + i * tile_rows
    valid = row_ids < batch_total             # (TB, 1) bool

    # Target-class log-softmax: log_p = (x_t - max) - log(sum(exp(x - max))).
    # Never materializes the full softmax matrix; no one-hot / mask multiplies.
    m = jnp.max(x, axis=1, keepdims=True)                     # (TB, 1)
    denom = jnp.sum(jnp.exp(x - m), axis=1, keepdims=True)    # (TB, 1)
    log_p = (x_t - m) - jnp.log(denom)                        # (TB, 1)
    probs = jnp.exp(log_p)                                    # (TB, 1)

    # (1 - p)^gamma : repeated multiply for integer gamma (no pow -> exp(log) path).
    q = 1.0 - probs
    g = float(gamma)
    if g == int(g) and int(g) >= 0:
        w = jnp.ones_like(q)
        for _ in range(int(g)):
            w = w * q
    else:
        w = jnp.power(q, g)

    per_row = -alpha_row * w * log_p                          # (TB, 1)
    o_ref[...] = jnp.where(valid, per_row, 0.0)


def _choose_tile_rows(B, C):
    # Budget ~4 MiB of f32 tile footprint, counting ~4 live (TB, C_padded) f32
    # intermediates (upcast x, x - m, exp(x - m), temps); Pallas double-buffers
    # the logits input on top of this. Sized to fit v7x's 64 MiB VMEM with the
    # 32 MiB scoped limit and plenty of headroom on v5e/v6e.
    budget = 4 * 1024 * 1024
    live = 4
    c_pad = ((C + 127) // 128) * 128          # lane padding of the C axis
    tb = budget // max(1, c_pad * 4 * live)
    tb = max(8, (min(tb, 1024) // 8) * 8)
    if B <= tb:
        return B                              # single full-batch block (always legal)
    return tb


def focal_loss(inputs, targets, alpha, gamma=2, size_average=True, tile_rows=None):
    """inputs: (B, C) logits (any float dtype — keep bf16 as bf16);
    targets: (B,) int class ids; alpha: (C,) or (C, 1) float per-class weights."""
    B, C = inputs.shape
    if tile_rows is None:
        tile_rows = _choose_tile_rows(B, C)
    grid = pl.cdiv(B, tile_rows)

    targets = targets.astype(jnp.int32)
    alpha_flat = alpha.reshape(-1).astype(jnp.float32)        # accepts (C,) or (C,1)

    # Hoisted per-row gathers (cheap in XLA, removes (TB, C) work from the kernel).
    alpha_row = alpha_flat[targets].reshape(B, 1)                              # (B,1) f32
    x_target = jnp.take_along_axis(inputs, targets.reshape(B, 1), axis=1)
    x_target = x_target.astype(jnp.float32)                                    # (B,1) f32

    kernel = functools.partial(
        _focal_loss_kernel,
        gamma=float(gamma),
        batch_total=B,
        tile_rows=tile_rows,
    )

    per_row = pl.pallas_call(
        kernel,
        out_shape=jax.ShapeDtypeStruct((B, 1), jnp.float32),
        grid=(grid,),
        in_specs=[
            pl.BlockSpec((tile_rows, C), lambda i: (i, 0)),   # logits tile (native dtype)
            pl.BlockSpec((tile_rows, 1), lambda i: (i, 0)),   # target-class logit
            pl.BlockSpec((tile_rows, 1), lambda i: (i, 0)),   # alpha[target]
        ],
        out_specs=pl.BlockSpec((tile_rows, 1), lambda i: (i, 0)),  # per-row loss
        compiler_params=pltpu.CompilerParams(
            dimension_semantics=("parallel",),                # distinct out blocks ->
            vmem_limit_bytes=32 * 1024 * 1024,                # dual-TC sharding on v7x
        ),
    )(inputs, x_target, alpha_row)

    total = jnp.sum(per_row)
    if size_average:
        return total / jnp.float32(B)
    return total


def focal_loss_ref(inputs, targets, alpha, gamma=2, size_average=True):
    """Pure-JAX reference mirroring the PyTorch forward."""
    B, C = inputs.shape
    x = inputs.astype(jnp.float32)
    P = jax.nn.softmax(x, axis=1)
    class_mask = jax.nn.one_hot(targets, C, dtype=jnp.float32)
    probs = jnp.sum(P * class_mask, axis=1, keepdims=True)
    alpha_row = alpha.reshape(-1).astype(jnp.float32)[targets].reshape(B, 1)
    log_p = jnp.log(probs)
    batch_loss = -alpha_row * jnp.power(1.0 - probs, float(gamma)) * log_p
    return jnp.mean(batch_loss) if size_average else jnp.sum(batch_loss)


if __name__ == "__main__":
    key = jax.random.PRNGKey(0)

    # --- check 1: small demo shapes (single tile) ---
    B, C = 8, 16
    k1, k2 = jax.random.split(key)
    inputs = jax.random.normal(k1, (B, C), dtype=jnp.float32)
    targets = jax.random.randint(k2, (B,), 0, C, dtype=jnp.int32)
    # deterministic init matching FocalLoss.__init__(alpha=None): 0.25 * ones(C, 1)
    alpha = 0.25 * jnp.ones((C, 1), dtype=jnp.float32)

    loss = focal_loss(inputs, targets, alpha, gamma=2, size_average=True)
    loss = jax.block_until_ready(loss)
    ref = focal_loss_ref(inputs, targets, alpha, gamma=2, size_average=True)
    assert jnp.allclose(loss, ref, rtol=1e-5, atol=1e-6), (loss, ref)

    # --- check 2: multi-tile grid with a ragged last tile (B=20, TB=8) ---
    B2 = 20
    k3, k4 = jax.random.split(k1)
    inputs2 = jax.random.normal(k3, (B2, C), dtype=jnp.float32)
    targets2 = jax.random.randint(k4, (B2,), 0, C, dtype=jnp.int32)

    loss2 = focal_loss(inputs2, targets2, alpha, gamma=2, size_average=True,
                       tile_rows=8)
    loss2 = jax.block_until_ready(loss2)
    ref2 = focal_loss_ref(inputs2, targets2, alpha, gamma=2, size_average=True)
    assert jnp.allclose(loss2, ref2, rtol=1e-5, atol=1e-6), (loss2, ref2)

    # --- check 3: sum reduction path ---
    loss3 = focal_loss(inputs2, targets2, alpha, gamma=2, size_average=False,
                       tile_rows=8)
    loss3 = jax.block_until_ready(loss3)
    ref3 = focal_loss_ref(inputs2, targets2, alpha, gamma=2, size_average=False)
    assert jnp.allclose(loss3, ref3, rtol=1e-5, atol=1e-5), (loss3, ref3)

    # --- check 4: bf16 logits fed end-to-end (HBM-bound lever on v5e/v6e) ---
    inputs_bf16 = inputs2.astype(jnp.bfloat16)
    loss4 = focal_loss(inputs_bf16, targets2, alpha, gamma=2, size_average=True,
                       tile_rows=8)
    loss4 = jax.block_until_ready(loss4)
    ref4 = focal_loss_ref(inputs_bf16, targets2, alpha, gamma=2, size_average=True)
    assert jnp.allclose(loss4, ref4, rtol=1e-4, atol=1e-5), (loss4, ref4)

    print("KERNEL_OK")
</pallas_src>

<mosaic_0001>
module attributes {stable_mosaic.version = 11 : i64} {
  func.func @_focal_loss_kernel(%arg0: i32, %arg1: memref<8x16xf32, #tpu.memory_space<vmem>>, %arg2: memref<8x1xf32, #tpu.memory_space<vmem>>, %arg3: memref<8x1xf32, #tpu.memory_space<vmem>>, %arg4: memref<8x1xf32, #tpu.memory_space<vmem>>) attributes {dimension_semantics = [#tpu.dimension_semantics<parallel>], iteration_bounds = array<i64: 1>, scalar_prefetch = 0 : i64, scratch_operands = 0 : i64, tpu.core_type = #tpu.core_type<tc>, window_params = [{transform_indices = @transform_0, window_bounds = array<i64: 8, 16>}, {transform_indices = @transform_1, window_bounds = array<i64: 8, 1>}, {transform_indices = @transform_2, window_bounds = array<i64: 8, 1>}, {transform_indices = @transform_3, window_bounds = array<i64: 8, 1>}]} {
    %c0 = arith.constant 0 : index
    %c0_0 = arith.constant 0 : index
    %0 = vector.load %arg1[%c0, %c0_0] : memref<8x16xf32, #tpu.memory_space<vmem>>, vector<8x16xf32>
    %c0_1 = arith.constant 0 : index
    %c0_2 = arith.constant 0 : index
    %1 = vector.load %arg2[%c0_1, %c0_2] : memref<8x1xf32, #tpu.memory_space<vmem>>, vector<8x1xf32>
    %c0_3 = arith.constant 0 : index
    %c0_4 = arith.constant 0 : index
    %2 = vector.load %arg3[%c0_3, %c0_4] : memref<8x1xf32, #tpu.memory_space<vmem>>, vector<8x1xf32>
    %3 = tpu.iota {dimensions = array<i32: 0>} : vector<8x1xi32>
    %c8_i32 = arith.constant 8 : i32
    %4 = arith.muli %arg0, %c8_i32 : i32
    %5 = vector.broadcast %4 : i32 to vector<8x1xi32>
    %6 = arith.addi %3, %5 : vector<8x1xi32>
    %c8_i32_5 = arith.constant 8 : i32
    %7 = vector.broadcast %c8_i32_5 : i32 to vector<8x1xi32>
    %8 = arith.cmpi slt, %6, %7 : vector<8x1xi32>
    %cst = arith.constant dense<0xFF800000> : vector<8xf32>
    %9 = vector.multi_reduction <maximumf>, %0, %cst [1] : vector<8x16xf32> to vector<8xf32>
    %10 = vector.shape_cast %9 : vector<8xf32> to vector<8x1xf32>
    %11 = vector.broadcast %10 : vector<8x1xf32> to vector<8x16xf32>
    %12 = arith.subf %0, %11 : vector<8x16xf32>
    %13 = math.exp %12 : vector<8x16xf32>
    %cst_6 = arith.constant dense<0.000000e+00> : vector<8xf32>
    %14 = vector.multi_reduction <add>, %13, %cst_6 [1] : vector<8x16xf32> to vector<8xf32>
    %15 = vector.shape_cast %14 : vector<8xf32> to vector<8x1xf32>
    %16 = arith.subf %1, %10 : vector<8x1xf32>
    %17 = math.log %15 : vector<8x1xf32>
    %18 = arith.subf %16, %17 : vector<8x1xf32>
    %19 = math.exp %18 : vector<8x1xf32>
    %cst_7 = arith.constant 1.000000e+00 : f32
    %20 = vector.broadcast %cst_7 : f32 to vector<8x1xf32>
    %21 = arith.subf %20, %19 : vector<8x1xf32>
    %cst_8 = arith.constant 1.000000e+00 : f32
    %22 = vector.broadcast %cst_8 : f32 to vector<8x1xf32>
    %23 = arith.mulf %22, %21 : vector<8x1xf32>
    %24 = arith.mulf %23, %21 : vector<8x1xf32>
    %cst_9 = arith.constant 0.000000e+00 : f32
    %25 = vector.broadcast %cst_9 : f32 to vector<8x1xf32>
    %26 = arith.subf %25, %2 : vector<8x1xf32>
    %27 = arith.mulf %26, %24 : vector<8x1xf32>
    %28 = arith.mulf %27, %18 : vector<8x1xf32>
    %cst_10 = arith.constant 0.000000e+00 : f32
    %29 = vector.broadcast %cst_10 : f32 to vector<8x1xf32>
    %30 = arith.select %8, %28, %29 : vector<8x1xi1>, vector<8x1xf32>
    %c0_11 = arith.constant 0 : index
    %c0_12 = arith.constant 0 : index
    %31 = vector.load %arg4[%c0_11, %c0_12] : memref<8x1xf32, #tpu.memory_space<vmem>>, vector<8x1xf32>
    tpu.vector_store %arg4[%c0_11, %c0_12], %30 {strides = array<i32>} : memref<8x1xf32, #tpu.memory_space<vmem>>, vector<8x1xf32>,
    return
  }
  func.func @transform_0(%arg0: i32) -> (i32, i32) {
    %c0_i32 = arith.constant 0 : i32
    %c0_i32_0 = arith.constant 0 : i32
    return %arg0, %c0_i32 : i32, i32
  }
  func.func @transform_1(%arg0: i32) -> (i32, i32) {
    %c0_i32 = arith.constant 0 : i32
    %c0_i32_0 = arith.constant 0 : i32
    return %arg0, %c0_i32 : i32, i32
  }
  func.func @transform_2(%arg0: i32) -> (i32, i32) {
    %c0_i32 = arith.constant 0 : i32
    %c0_i32_0 = arith.constant 0 : i32
    return %arg0, %c0_i32 : i32, i32
  }
  func.func @transform_3(%arg0: i32) -> (i32, i32) {
    %c0_i32 = arith.constant 0 : i32
    %c0_i32_0 = arith.constant 0 : i32
    return %arg0, %c0_i32 : i32, i32
  }
}

</mosaic_0001>

<bundles_post_ra>
// kernel: tpu_custom_call.1
= control target key start
LH: loop header
LB: loop body
LE: loop exit
PB: predicated region body
PF: predicated region fallthrough
CT: control target
= control target key end

     0   :  { %vm23_vm0 = vcmask 130048   ;;  %vm45_vm1 = vcmask 7168   ;;  %s89_s0 = inlined_call_operand.vmem [shape: f32[8,16], index: 0, kind: input, shape index: {}]   ;;  %s90_s1 = inlined_call_operand.vmem [shape: f32[8,1], index: 1, kind: input, shape index: {}]   ;;  %s91_s2 = inlined_call_operand.vmem [shape: f32[8,1], index: 2, kind: input, shape index: {}]   ;;  %s92_s3 = inlined_call_operand.vmem [shape: f32[8,1], index: 3, kind: output, shape index: {}]  }
   0x1   :  { %v14_v0 = vld [vmem:[%s89_s0] sm:$0xff] }
   0x2   :  { %v24_v1 = vsel %vm23_vm0, %v14_v0, -inf  ;;  %v15_v8 = vld [vmem:[%s90_s1] sm:$0xff] }
   0x3   :  { %25 = vmax.xlane.f32.xlu0 %v24_v1  ;;  %v16_v14 = vld [vmem:[%s91_s2] sm:$0xff] }
   0x4   :  { %v41_v16 = vsub.f32 0.0, %v16_v14 }
  0x90   :  { %v26_v2 = vpop.xlane.xlu0 %25 }
  0x91   :  { %v27_v3 = vsub.f32 %v14_v0, %v26_v2  ;;  %v33_v10 = vsub.f32 %v15_v8, %v26_v2 }
  0x93   :  { %v28_v4 = vmul.f32 1.442695, %v27_v3 }
  0x95   :  { %51 = vpow2.f32 %v28_v4 }
  0x9f   :  { %v52_v5 = vpop.eup %51 }
  0xa0   :  { %v30_v6 = vsel %vm23_vm0, %v52_v5, 0.0 }
  0xa1   :  { %31 = vadd.xlane.f32.xlu0 %v30_v6 }
 0x12e   :  { %v32_v7 = vpop.xlane.xlu0 %31 }
 0x12f   :  { %53 = vlog2.f32 %v32_v7 }
 0x139   :  { %v54_v9 = vpop.eup %53 }
 0x13a   :  { %v35_v11 = vmul.f32 0.6931472, %v54_v9 }
 0x13c   :  { %v36_v12 = vsub.f32 %v33_v10, %v35_v11 }
 0x13e   :  { %v37_v13 = vmul.f32 1.442695, %v36_v12 }
 0x140   :  { %55 = vpow2.f32 %v37_v13 }
 0x14a   :  { %v56_v15 = vpop.eup %55 }
 0x14b   :  { %v39_v17 = vsub.f32 1.0, %v56_v15 }
 0x14d   :  { %v40_v18 = vmul.f32 %v39_v17, %v39_v17 }
 0x14f   :  { %v42_v19 = vmul.f32 %v41_v16, %v40_v18 }
 0x151   :  { %v43_v20 = vmul.f32 %v42_v19, %v36_v12 }
 0x153   :  { %46 = vst.msk [vmem:[%s92_s3] sm:$0xff] %vm45_vm1, %v43_v20 }

</bundles_post_ra>
